<compile_context>
chip_gen: v6e
topology: v6e:2x2x1
jax: 0.10.0
libtpu: 0.0.40
codegen_flags: <defaults>
</compile_context>

<pallas_src>
import jax
import jax.numpy as jnp
from jax.experimental import pallas as pl
from jax.experimental.pallas import tpu as pltpu

_LANES = 128
_SUBLANES = 8


def _add_kernel(a_ref, b_ref, o_ref):
    # Pure VPU elementwise add on the VMEM-resident tile.
    o_ref[...] = a_ref[...] + b_ref[...]


def _pallas_add_impl(x56: jax.Array, x42: jax.Array) -> jax.Array:
    """Implements M.forward: x57 = x56 + x42 (elementwise, no broadcasting)."""
    assert x56.shape == x42.shape and x56.dtype == x42.dtype
    orig_shape = x56.shape
    total = int(x56.size)
    itemsize = jnp.dtype(x56.dtype).itemsize
    # 2 reads + 1 write of the full tensor; one add per element.
    cost = pl.CostEstimate(
        flops=total, transcendentals=0, bytes_accessed=3 * total * itemsize
    )

    lane_dense = (total % _LANES == 0) and ((total // _LANES) % _SUBLANES == 0)

    if not lane_dense:
        # Fallback for shapes that can't be reflattened lane-dense: keep the
        # original N-D shape and use whole-array VMEM blocks (always legal,
        # avoids reintroducing a narrow masked last dim).
        return pl.pallas_call(
            _add_kernel,
            out_shape=jax.ShapeDtypeStruct(orig_shape, x56.dtype),
            in_specs=[
                pl.BlockSpec(memory_space=pltpu.MemorySpace.VMEM),
                pl.BlockSpec(memory_space=pltpu.MemorySpace.VMEM),
            ],
            out_specs=pl.BlockSpec(memory_space=pltpu.MemorySpace.VMEM),
            cost_estimate=cost,
        )(x56, x42)

    rows, cols = total // _LANES, _LANES
    # Contiguous row-major flatten: free (bitcast under jit), numerically exact.
    a2 = x56.reshape(rows, cols)
    b2 = x42.reshape(rows, cols)

    # Small pipelined grid: 2 steps if the rows split cleanly into
    # sublane-aligned halves (784 -> 2 x 392), else a single whole-array step.
    n_blocks = 2 if rows % (2 * _SUBLANES) == 0 else 1
    block_rows = rows // n_blocks

    out2 = pl.pallas_call(
        _add_kernel,
        out_shape=jax.ShapeDtypeStruct((rows, cols), x56.dtype),
        grid=(n_blocks,),
        in_specs=[
            pl.BlockSpec((block_rows, cols), lambda i: (i, 0)),
            pl.BlockSpec((block_rows, cols), lambda i: (i, 0)),
        ],
        out_specs=pl.BlockSpec((block_rows, cols), lambda i: (i, 0)),
        cost_estimate=cost,
        compiler_params=pltpu.CompilerParams(
            dimension_semantics=("parallel",)
        ),
    )(a2, b2)

    return out2.reshape(orig_shape)


# Single jit over the whole path: reshapes become bitcasts, one dispatch.
pallas_add = jax.jit(_pallas_add_impl)


if __name__ == "__main__":
    key = jax.random.PRNGKey(0)
    k1, k2 = jax.random.split(key)
    # Module operates on [1, 32, 56, 56]; already small (~392 KiB per tensor).
    shape = (1, 32, 56, 56)
    x56 = jax.random.normal(k1, shape, dtype=jnp.float32)
    x42 = jax.random.normal(k2, shape, dtype=jnp.float32)

    out = pallas_add(x56, x42)
    jax.block_until_ready(out)

    # Correctness check against plain JAX reference.
    ref = x56 + x42
    assert out.shape == shape
    assert jnp.allclose(out, ref, atol=1e-6, rtol=1e-6)
    print("KERNEL_OK")
</pallas_src>

<mosaic_0001>
module attributes {stable_mosaic.version = 11 : i64} {
  func.func @_add_kernel(%arg0: i32, %arg1: memref<392x128xf32, #tpu.memory_space<vmem>>, %arg2: memref<392x128xf32, #tpu.memory_space<vmem>>, %arg3: memref<392x128xf32, #tpu.memory_space<vmem>>) attributes {dimension_semantics = [#tpu.dimension_semantics<parallel>], iteration_bounds = array<i64: 2>, scalar_prefetch = 0 : i64, scratch_operands = 0 : i64, tpu.core_type = #tpu.core_type<tc>, window_params = [{transform_indices = @transform_0, window_bounds = array<i64: 392, 128>}, {transform_indices = @transform_1, window_bounds = array<i64: 392, 128>}, {transform_indices = @transform_2, window_bounds = array<i64: 392, 128>}]} {
    %c0 = arith.constant 0 : index
    %c0_0 = arith.constant 0 : index
    %0 = vector.load %arg1[%c0, %c0_0] : memref<392x128xf32, #tpu.memory_space<vmem>>, vector<392x128xf32>
    %c0_1 = arith.constant 0 : index
    %c0_2 = arith.constant 0 : index
    %1 = vector.load %arg2[%c0_1, %c0_2] : memref<392x128xf32, #tpu.memory_space<vmem>>, vector<392x128xf32>
    %2 = arith.addf %0, %1 : vector<392x128xf32>
    %c0_3 = arith.constant 0 : index
    %c0_4 = arith.constant 0 : index
    %3 = vector.load %arg3[%c0_3, %c0_4] : memref<392x128xf32, #tpu.memory_space<vmem>>, vector<392x128xf32>
    tpu.vector_store %arg3[%c0_3, %c0_4], %2 {strides = array<i32>} : memref<392x128xf32, #tpu.memory_space<vmem>>, vector<392x128xf32>,
    return
  }
  func.func @transform_0(%arg0: i32) -> (i32, i32) {
    %c0_i32 = arith.constant 0 : i32
    %c0_i32_0 = arith.constant 0 : i32
    return %arg0, %c0_i32 : i32, i32
  }
  func.func @transform_1(%arg0: i32) -> (i32, i32) {
    %c0_i32 = arith.constant 0 : i32
    %c0_i32_0 = arith.constant 0 : i32
    return %arg0, %c0_i32 : i32, i32
  }
  func.func @transform_2(%arg0: i32) -> (i32, i32) {
    %c0_i32 = arith.constant 0 : i32
    %c0_i32_0 = arith.constant 0 : i32
    return %arg0, %c0_i32 : i32, i32
  }
}

</mosaic_0001>

<bundles_post_ra>
// kernel: _pallas_add_impl.1
= control target key start
LH: loop header
LB: loop body
LE: loop exit
PB: predicated region body
PF: predicated region fallthrough
CT: control target
= control target key end

     0   :  { %s474_s9 = smov 0   ;;  %s647_s0 = inlined_call_operand.vmem [shape: f32[784,128], index: 0, kind: input, shape index: {}]   ;;  %s648_s1 = inlined_call_operand.vmem [shape: f32[784,128], index: 1, kind: input, shape index: {}]   ;;  %s649_s2 = inlined_call_operand.vmem [shape: f32[784,128], index: 2, kind: output, shape index: {}]  }
   0x1 LB: > { %s433_s10 = sadd.s32 4294967295, %s457_s9   ;;  %p437_p0 = scmp.ge.s32.totalorder %s457_s9, 1  ;;  %s457_s9 = sphi %s474_s9, %s12_s9  }
   0x2   : > { %p124_p1 = scmp.lt.s32.totalorder %s457_s9, 3 }
   0x4   : > { %p125_p2 = pnand %p437_p0, %p124_p1 }
   0x5   : > { %s151_s11 = smul.u32 (!%p125_p2), 49, %s433_s10 }
   0x6   : > { %128 = sbr.rel (%p125_p2) target bundleno = 56 (0x38), region = 28 }
   0x7   : > { %p152_p3 = scmp.lt.s32.totalorder (!%p125_p2), %s151_s11, 97 }
   0xb   : > { %s651_s11 = smov (!%p152_p3, %s151_s11), 97 }
   0xc   : > { %s438_s12 = sshll.u32 %s651_s11, 3 }
   0xd   : > { %s485_s15 = scalar_lea.vmem %s647_s0, %s438_s12  ;;  %s490_s18 = scalar_lea.vmem %s648_s1, %s438_s12 }
   0xe   : > { %s495_s21 = scalar_lea.vmem %s649_s2, %s438_s12  ;;  %v169_v0 = vld [vmem:[%s485_s15] sm:$0xff]  ;;  %v170_v2 = vld [vmem:[%s485_s15 + $0x8] sm:$0xff]  ;;  %v171_v5 = vld [vmem:[%s485_s15 + $0x10] sm:$0xff] }
   0xf   : > { %v218_v1 = vld [vmem:[%s490_s18] sm:$0xff]  ;;  %v219_v4 = vld [vmem:[%s490_s18 + $0x8] sm:$0xff]  ;;  %v220_v6 = vld [vmem:[%s490_s18 + $0x10] sm:$0xff] }
  0x10   : > { %v267_v3 = vadd.f32 %v218_v1, %v169_v0  ;;  %v268_v7 = vadd.f32 %v219_v4, %v170_v2  ;;  %v269_v8 = vadd.f32 %v220_v6, %v171_v5  ;;  %v172_v9 = vld [vmem:[%s485_s15 + $0x18] sm:$0xff]  ;;  %v173_v11 = vld [vmem:[%s485_s15 + $0x20] sm:$0xff]  ;;  %v174_v14 = vld [vmem:[%s485_s15 + $0x28] sm:$0xff] }
  0x11   : > { %v221_v10 = vld [vmem:[%s490_s18 + $0x18] sm:$0xff]  ;;  %v222_v13 = vld [vmem:[%s490_s18 + $0x20] sm:$0xff]  ;;  %v223_v15 = vld [vmem:[%s490_s18 + $0x28] sm:$0xff] }
  0x12   : > { %316 = vst [vmem:[%s495_s21] sm:$0xff] %v267_v3  ;;  %v270_v12 = vadd.f32 %v221_v10, %v172_v9  ;;  %317 = vst [vmem:[%s495_s21 + $0x8] sm:$0xff] %v268_v7  ;;  %v271_v16 = vadd.f32 %v222_v13, %v173_v11  ;;  %v272_v17 = vadd.f32 %v223_v15, %v174_v14  ;;  %v175_v18 = vld [vmem:[%s485_s15 + $0x30] sm:$0xff]  ;;  %v176_v20 = vld [vmem:[%s485_s15 + $0x38] sm:$0xff] }
  0x13   : > { %318 = vst [vmem:[%s495_s21 + $0x10] sm:$0xff] %v269_v8  ;;  %v224_v19 = vld [vmem:[%s490_s18 + $0x30] sm:$0xff]  ;;  %v225_v22 = vld [vmem:[%s490_s18 + $0x38] sm:$0xff]  ;;  %v177_v23 = vld [vmem:[%s485_s15 + $0x40] sm:$0xff] }
  0x14   : > { %319 = vst [vmem:[%s495_s21 + $0x18] sm:$0xff] %v270_v12  ;;  %v273_v21 = vadd.f32 %v224_v19, %v175_v18  ;;  %v226_v24 = vld [vmem:[%s490_s18 + $0x40] sm:$0xff]  ;;  %320 = vst [vmem:[%s495_s21 + $0x20] sm:$0xff] %v271_v16  ;;  %v274_v25 = vadd.f32 %v225_v22, %v176_v20  ;;  %v178_v27 = vld [vmem:[%s485_s15 + $0x48] sm:$0xff] }
  0x15   : > { %321 = vst [vmem:[%s495_s21 + $0x28] sm:$0xff] %v272_v17  ;;  %v275_v26 = vadd.f32 %v226_v24, %v177_v23  ;;  %v227_v28 = vld [vmem:[%s490_s18 + $0x48] sm:$0xff]  ;;  %v179_v29 = vld [vmem:[%s485_s15 + $0x50] sm:$0xff]  ;;  %v180_v32 = vld [vmem:[%s485_s15 + $0x58] sm:$0xff] }
  0x16   : > { %322 = vst [vmem:[%s495_s21 + $0x30] sm:$0xff] %v273_v21  ;;  %v276_v30 = vadd.f32 %v227_v28, %v178_v27  ;;  %v228_v31 = vld [vmem:[%s490_s18 + $0x50] sm:$0xff]  ;;  %v229_v33 = vld [vmem:[%s490_s18 + $0x58] sm:$0xff]  ;;  %323 = vst [vmem:[%s495_s21 + $0x38] sm:$0xff] %v274_v25 }
  0x17   : > { %324 = vst [vmem:[%s495_s21 + $0x40] sm:$0xff] %v275_v26  ;;  %v277_v34 = vadd.f32 %v228_v31, %v179_v29  ;;  %v278_v35 = vadd.f32 %v229_v33, %v180_v32  ;;  %v181_v36 = vld [vmem:[%s485_s15 + $0x60] sm:$0xff]  ;;  %v182_v38 = vld [vmem:[%s485_s15 + $0x68] sm:$0xff]  ;;  %v183_v41 = vld [vmem:[%s485_s15 + $0x70] sm:$0xff] }
  0x18   : > { %v230_v37 = vld [vmem:[%s490_s18 + $0x60] sm:$0xff]  ;;  %325 = vst [vmem:[%s495_s21 + $0x48] sm:$0xff] %v276_v30  ;;  %v231_v40 = vld [vmem:[%s490_s18 + $0x68] sm:$0xff]  ;;  %v232_v42 = vld [vmem:[%s490_s18 + $0x70] sm:$0xff] }
  0x19   : > { %v279_v39 = vadd.f32 %v230_v37, %v181_v36  ;;  %326 = vst [vmem:[%s495_s21 + $0x50] sm:$0xff] %v277_v34  ;;  %327 = vst [vmem:[%s495_s21 + $0x58] sm:$0xff] %v278_v35  ;;  %v280_v43 = vadd.f32 %v231_v40, %v182_v38  ;;  %v281_v44 = vadd.f32 %v232_v42, %v183_v41  ;;  %v184_v45 = vld [vmem:[%s485_s15 + $0x78] sm:$0xff]  ;;  %v185_v47 = vld [vmem:[%s485_s15 + $0x80] sm:$0xff] }
  0x1a   : > { %v233_v46 = vld [vmem:[%s490_s18 + $0x78] sm:$0xff]  ;;  %v234_v49 = vld [vmem:[%s490_s18 + $0x80] sm:$0xff]  ;;  %v186_v50 = vld [vmem:[%s485_s15 + $0x88] sm:$0xff] }
  0x1b   : > { %328 = vst [vmem:[%s495_s21 + $0x60] sm:$0xff] %v279_v39  ;;  %v282_v48 = vadd.f32 %v233_v46, %v184_v45  ;;  %v235_v51 = vld [vmem:[%s490_s18 + $0x88] sm:$0xff]  ;;  %329 = vst [vmem:[%s495_s21 + $0x68] sm:$0xff] %v280_v43  ;;  %v283_v52 = vadd.f32 %v234_v49, %v185_v47  ;;  %v187_v54 = vld [vmem:[%s485_s15 + $0x90] sm:$0xff] }
  0x1c   : > { %330 = vst [vmem:[%s495_s21 + $0x70] sm:$0xff] %v281_v44  ;;  %v284_v53 = vadd.f32 %v235_v51, %v186_v50  ;;  %v236_v55 = vld [vmem:[%s490_s18 + $0x90] sm:$0xff]  ;;  %v188_v56 = vld [vmem:[%s485_s15 + $0x98] sm:$0xff]  ;;  %v189_v59 = vld [vmem:[%s485_s15 + $0xa0] sm:$0xff] }
  0x1d   : > { %331 = vst [vmem:[%s495_s21 + $0x78] sm:$0xff] %v282_v48  ;;  %v285_v57 = vadd.f32 %v236_v55, %v187_v54  ;;  %v237_v58 = vld [vmem:[%s490_s18 + $0x98] sm:$0xff]  ;;  %v238_v60 = vld [vmem:[%s490_s18 + $0xa0] sm:$0xff]  ;;  %332 = vst [vmem:[%s495_s21 + $0x80] sm:$0xff] %v283_v52 }
  0x1e   : > { %333 = vst [vmem:[%s495_s21 + $0x88] sm:$0xff] %v284_v53  ;;  %v286_v61 = vadd.f32 %v237_v58, %v188_v56  ;;  %v287_v62 = vadd.f32 %v238_v60, %v189_v59  ;;  %v190_v63 = vld [vmem:[%s485_s15 + $0xa8] sm:$0xff]  ;;  %v191_v1 = vld [vmem:[%s485_s15 + $0xb0] sm:$0xff]  ;;  %v192_v4 = vld [vmem:[%s485_s15 + $0xb8] sm:$0xff] }
  0x1f   : > { %v239_v0 = vld [vmem:[%s490_s18 + $0xa8] sm:$0xff]  ;;  %334 = vst [vmem:[%s495_s21 + $0x90] sm:$0xff] %v285_v57  ;;  %v240_v3 = vld [vmem:[%s490_s18 + $0xb0] sm:$0xff]  ;;  %v241_v5 = vld [vmem:[%s490_s18 + $0xb8] sm:$0xff] }
  0x20   : > { %v288_v2 = vadd.f32 %v239_v0, %v190_v63  ;;  %335 = vst [vmem:[%s495_s21 + $0x98] sm:$0xff] %v286_v61  ;;  %336 = vst [vmem:[%s495_s21 + $0xa0] sm:$0xff] %v287_v62  ;;  %v289_v6 = vadd.f32 %v240_v3, %v191_v1  ;;  %v290_v7 = vadd.f32 %v241_v5, %v192_v4  ;;  %v193_v8 = vld [vmem:[%s485_s15 + $0xc0] sm:$0xff]  ;;  %v194_v10 = vld [vmem:[%s485_s15 + $0xc8] sm:$0xff] }
  0x21   : > { %v242_v9 = vld [vmem:[%s490_s18 + $0xc0] sm:$0xff]  ;;  %v243_v12 = vld [vmem:[%s490_s18 + $0xc8] sm:$0xff]  ;;  %v195_v13 = vld [vmem:[%s485_s15 + $0xd0] sm:$0xff] }
  0x22   : > { %337 = vst [vmem:[%s495_s21 + $0xa8] sm:$0xff] %v288_v2  ;;  %v291_v11 = vadd.f32 %v242_v9, %v193_v8  ;;  %v244_v14 = vld [vmem:[%s490_s18 + $0xd0] sm:$0xff]  ;;  %338 = vst [vmem:[%s495_s21 + $0xb0] sm:$0xff] %v289_v6  ;;  %v292_v15 = vadd.f32 %v243_v12, %v194_v10  ;;  %v196_v17 = vld [vmem:[%s485_s15 + $0xd8] sm:$0xff] }
  0x23   : > { %339 = vst [vmem:[%s495_s21 + $0xb8] sm:$0xff] %v290_v7  ;;  %v293_v16 = vadd.f32 %v244_v14, %v195_v13  ;;  %v245_v18 = vld [vmem:[%s490_s18 + $0xd8] sm:$0xff]  ;;  %v197_v19 = vld [vmem:[%s485_s15 + $0xe0] sm:$0xff]  ;;  %v198_v22 = vld [vmem:[%s485_s15 + $0xe8] sm:$0xff] }
  0x24   : > { %340 = vst [vmem:[%s495_s21 + $0xc0] sm:$0xff] %v291_v11  ;;  %v294_v20 = vadd.f32 %v245_v18, %v196_v17  ;;  %v246_v21 = vld [vmem:[%s490_s18 + $0xe0] sm:$0xff]  ;;  %v247_v23 = vld [vmem:[%s490_s18 + $0xe8] sm:$0xff]  ;;  %341 = vst [vmem:[%s495_s21 + $0xc8] sm:$0xff] %v292_v15 }
  0x25   : > { %342 = vst [vmem:[%s495_s21 + $0xd0] sm:$0xff] %v293_v16  ;;  %v295_v24 = vadd.f32 %v246_v21, %v197_v19  ;;  %v296_v25 = vadd.f32 %v247_v23, %v198_v22  ;;  %v199_v26 = vld [vmem:[%s485_s15 + $0xf0] sm:$0xff]  ;;  %v200_v28 = vld [vmem:[%s485_s15 + $0xf8] sm:$0xff]  ;;  %v201_v31 = vld [vmem:[%s485_s15 + $0x100] sm:$0xff] }
  0x26   : > { %v248_v27 = vld [vmem:[%s490_s18 + $0xf0] sm:$0xff]  ;;  %343 = vst [vmem:[%s495_s21 + $0xd8] sm:$0xff] %v294_v20  ;;  %v249_v30 = vld [vmem:[%s490_s18 + $0xf8] sm:$0xff]  ;;  %v250_v32 = vld [vmem:[%s490_s18 + $0x100] sm:$0xff] }
  0x27   : > { %v297_v29 = vadd.f32 %v248_v27, %v199_v26  ;;  %344 = vst [vmem:[%s495_s21 + $0xe0] sm:$0xff] %v295_v24  ;;  %345 = vst [vmem:[%s495_s21 + $0xe8] sm:$0xff] %v296_v25  ;;  %v298_v33 = vadd.f32 %v249_v30, %v200_v28  ;;  %v299_v34 = vadd.f32 %v250_v32, %v201_v31  ;;  %v202_v35 = vld [vmem:[%s485_s15 + $0x108] sm:$0xff]  ;;  %v203_v37 = vld [vmem:[%s485_s15 + $0x110] sm:$0xff] }
  0x28   : > { %v251_v36 = vld [vmem:[%s490_s18 + $0x108] sm:$0xff]  ;;  %v252_v39 = vld [vmem:[%s490_s18 + $0x110] sm:$0xff]  ;;  %v204_v40 = vld [vmem:[%s485_s15 + $0x118] sm:$0xff] }
  0x29   : > { %346 = vst [vmem:[%s495_s21 + $0xf0] sm:$0xff] %v297_v29  ;;  %v300_v38 = vadd.f32 %v251_v36, %v202_v35  ;;  %v253_v41 = vld [vmem:[%s490_s18 + $0x118] sm:$0xff]  ;;  %347 = vst [vmem:[%s495_s21 + $0xf8] sm:$0xff] %v298_v33  ;;  %v301_v42 = vadd.f32 %v252_v39, %v203_v37  ;;  %v205_v44 = vld [vmem:[%s485_s15 + $0x120] sm:$0xff] }
  0x2a   : > { %348 = vst [vmem:[%s495_s21 + $0x100] sm:$0xff] %v299_v34  ;;  %v302_v43 = vadd.f32 %v253_v41, %v204_v40  ;;  %v254_v45 = vld [vmem:[%s490_s18 + $0x120] sm:$0xff]  ;;  %v206_v46 = vld [vmem:[%s485_s15 + $0x128] sm:$0xff]  ;;  %v207_v49 = vld [vmem:[%s485_s15 + $0x130] sm:$0xff] }
  0x2b   : > { %349 = vst [vmem:[%s495_s21 + $0x108] sm:$0xff] %v300_v38  ;;  %v303_v47 = vadd.f32 %v254_v45, %v205_v44  ;;  %v255_v48 = vld [vmem:[%s490_s18 + $0x128] sm:$0xff]  ;;  %v256_v50 = vld [vmem:[%s490_s18 + $0x130] sm:$0xff]  ;;  %350 = vst [vmem:[%s495_s21 + $0x110] sm:$0xff] %v301_v42 }
  0x2c   : > { %351 = vst [vmem:[%s495_s21 + $0x118] sm:$0xff] %v302_v43  ;;  %v304_v51 = vadd.f32 %v255_v48, %v206_v46  ;;  %v305_v52 = vadd.f32 %v256_v50, %v207_v49  ;;  %v208_v53 = vld [vmem:[%s485_s15 + $0x138] sm:$0xff]  ;;  %v209_v55 = vld [vmem:[%s485_s15 + $0x140] sm:$0xff]  ;;  %v210_v58 = vld [vmem:[%s485_s15 + $0x148] sm:$0xff] }
  0x2d   : > { %v257_v54 = vld [vmem:[%s490_s18 + $0x138] sm:$0xff]  ;;  %352 = vst [vmem:[%s495_s21 + $0x120] sm:$0xff] %v303_v47  ;;  %v258_v57 = vld [vmem:[%s490_s18 + $0x140] sm:$0xff]  ;;  %v259_v59 = vld [vmem:[%s490_s18 + $0x148] sm:$0xff] }
  0x2e   : > { %v306_v56 = vadd.f32 %v257_v54, %v208_v53  ;;  %353 = vst [vmem:[%s495_s21 + $0x128] sm:$0xff] %v304_v51  ;;  %354 = vst [vmem:[%s495_s21 + $0x130] sm:$0xff] %v305_v52  ;;  %v307_v60 = vadd.f32 %v258_v57, %v209_v55  ;;  %v308_v61 = vadd.f32 %v259_v59, %v210_v58  ;;  %v211_v62 = vld [vmem:[%s485_s15 + $0x150] sm:$0xff]  ;;  %v212_v0 = vld [vmem:[%s485_s15 + $0x158] sm:$0xff] }
  0x2f   : > { %v260_v63 = vld [vmem:[%s490_s18 + $0x150] sm:$0xff]  ;;  %v261_v2 = vld [vmem:[%s490_s18 + $0x158] sm:$0xff]  ;;  %v213_v3 = vld [vmem:[%s485_s15 + $0x160] sm:$0xff] }
  0x30   : > { %355 = vst [vmem:[%s495_s21 + $0x138] sm:$0xff] %v306_v56  ;;  %v309_v1 = vadd.f32 %v260_v63, %v211_v62  ;;  %v262_v4 = vld [vmem:[%s490_s18 + $0x160] sm:$0xff]  ;;  %356 = vst [vmem:[%s495_s21 + $0x140] sm:$0xff] %v307_v60  ;;  %v310_v5 = vadd.f32 %v261_v2, %v212_v0  ;;  %v214_v7 = vld [vmem:[%s485_s15 + $0x168] sm:$0xff] }
  0x31   : > { %357 = vst [vmem:[%s495_s21 + $0x148] sm:$0xff] %v308_v61  ;;  %v311_v6 = vadd.f32 %v262_v4, %v213_v3  ;;  %v263_v8 = vld [vmem:[%s490_s18 + $0x168] sm:$0xff]  ;;  %v215_v9 = vld [vmem:[%s485_s15 + $0x170] sm:$0xff]  ;;  %v216_v12 = vld [vmem:[%s485_s15 + $0x178] sm:$0xff] }
  0x32   : > { %358 = vst [vmem:[%s495_s21 + $0x150] sm:$0xff] %v309_v1  ;;  %v312_v10 = vadd.f32 %v263_v8, %v214_v7  ;;  %v264_v11 = vld [vmem:[%s490_s18 + $0x170] sm:$0xff]  ;;  %v265_v13 = vld [vmem:[%s490_s18 + $0x178] sm:$0xff]  ;;  %359 = vst [vmem:[%s495_s21 + $0x158] sm:$0xff] %v310_v5 }
  0x33   : > { %360 = vst [vmem:[%s495_s21 + $0x160] sm:$0xff] %v311_v6  ;;  %v313_v14 = vadd.f32 %v264_v11, %v215_v9  ;;  %v314_v15 = vadd.f32 %v265_v13, %v216_v12  ;;  %v217_v16 = vld [vmem:[%s485_s15 + $0x180] sm:$0xff] }
  0x34   : > { %v266_v17 = vld [vmem:[%s490_s18 + $0x180] sm:$0xff]  ;;  %361 = vst [vmem:[%s495_s21 + $0x168] sm:$0xff] %v312_v10 }
  0x35   : > { %v315_v18 = vadd.f32 %v266_v17, %v217_v16  ;;  %362 = vst [vmem:[%s495_s21 + $0x170] sm:$0xff] %v313_v14  ;;  %363 = vst [vmem:[%s495_s21 + $0x178] sm:$0xff] %v314_v15 }
  0x37   : > { %364 = vst [vmem:[%s495_s21 + $0x180] sm:$0xff] %v315_v18 }
  0x38 PF: > { %s12_s9 = sadd.s32 1, %s457_s9  }
  0x39   : > { %p9_p4 = scmp.ge.s32.totalorder %s12_s9, 4  }
  0x3b   :  { %11 = sbr.rel (!%p9_p4) target bundleno = 1 (0x1), region = 61 }

</bundles_post_ra>
